<compile_context>
chip_gen: v7x
topology: tpu7x:2x2x1
jax: 0.10.0
libtpu: 0.0.40
codegen_flags: <defaults>
</compile_context>

<pallas_src>
import functools

import jax
import jax.numpy as jnp
from jax.experimental import pallas as pl
from jax.experimental.pallas import tpu as pltpu


# --------------------------------------------------------------------------- kernel
def _ensemble_kernel(state_ref, w1_ref, w2_ref, w3_ref, bias_ref, probs_ref,
                     *, num_actors, num_actions):
    """Fused forward of the whole ensemble.

    state_ref : (B, num_inputs)   f32
    w1_ref    : (num_inputs, N*H) bf16  -- concat of per-actor W1
    w2_ref    : (N*H, N*H)        bf16  -- block-diag of per-actor W2
    w3_ref    : (N*H, N*A)        bf16  -- block-diag of per-actor W3
    bias_ref  : (3, N*H)          f32   -- rows = [b1 | b2 | b3 (zero-padded)]
    probs_ref : (B, num_actions)  f32   -- mean over actors of softmax(logits)
    """
    na = num_actors * num_actions

    x = state_ref[...]                                   # (B, in) f32
    b1 = bias_ref[0:1, :]                                # (1, N*H)
    b2 = bias_ref[1:2, :]                                # (1, N*H)
    b3 = bias_ref[2:3, :na]                              # (1, N*A)

    # 3 packed matmuls (bf16 inputs, f32 accumulate); bias/ReLU in f32.
    h = jnp.dot(x.astype(jnp.bfloat16), w1_ref[...],
                preferred_element_type=jnp.float32) + b1
    h = jnp.maximum(h, 0.0)
    h = jnp.dot(h.astype(jnp.bfloat16), w2_ref[...],
                preferred_element_type=jnp.float32) + b2
    h = jnp.maximum(h, 0.0)
    logits = jnp.dot(h.astype(jnp.bfloat16), w3_ref[...],
                     preferred_element_type=jnp.float32) + b3      # (B, N*A)

    # Per-actor softmax over its own `num_actions` slice, then mean over actors.
    acc = jnp.zeros((logits.shape[0], num_actions), jnp.float32)
    for i in range(num_actors):                          # static, tiny unroll
        li = logits[:, i * num_actions:(i + 1) * num_actions]
        m = jnp.max(li, axis=1, keepdims=True)
        e = jnp.exp(li - m)
        acc = acc + e / jnp.sum(e, axis=1, keepdims=True)
    probs_ref[...] = acc * (1.0 / num_actors)


# --------------------------------------------------------------------------- wrappers
def ensemble_mean_probs(state, packed):
    """Pallas forward: mean over actors of per-actor action probabilities."""
    B = state.shape[0]
    A = packed["num_actions"]
    kernel = functools.partial(_ensemble_kernel,
                               num_actors=packed["num_actors"],
                               num_actions=A)
    vmem = pl.BlockSpec(memory_space=pltpu.MemorySpace.VMEM)
    return pl.pallas_call(
        kernel,
        out_shape=jax.ShapeDtypeStruct((B, A), jnp.float32),
        in_specs=[vmem] * 5,
        out_specs=vmem,
    )(state, packed["w1"], packed["w2"], packed["w3"], packed["bias"])


def ensemble_forward(state, packed):
    """Equivalent of Ensemble.forward: argmax over actions of ensemble-mean probs."""
    return jnp.argmax(ensemble_mean_probs(state, packed), axis=1)


# TODO(synk): Ensemble.sample() (python random.choice over per-actor samples) is
# host-side stochastic control flow with no clean single-kernel equivalent.


# --------------------------------------------------------------------------- host-side packing
def _block_diag(blocks):
    rows = sum(b.shape[0] for b in blocks)
    cols = sum(b.shape[1] for b in blocks)
    out = jnp.zeros((rows, cols), blocks[0].dtype)
    r = c = 0
    for b in blocks:
        out = out.at[r:r + b.shape[0], c:c + b.shape[1]].set(b)
        r += b.shape[0]
        c += b.shape[1]
    return out


def pack_ensemble(actor_params):
    """Build packed block-diagonal ensemble weights once on the host."""
    n = len(actor_params)
    a0 = actor_params[0]
    hidden = a0["w1"].shape[1]
    num_actions = a0["w3"].shape[1]

    w1p = jnp.concatenate([a["w1"] for a in actor_params], axis=1)   # (in, N*H)
    w2p = _block_diag([a["w2"] for a in actor_params])               # (N*H, N*H)
    w3p = _block_diag([a["w3"] for a in actor_params])               # (N*H, N*A)

    b1p = jnp.concatenate([a["b1"] for a in actor_params], axis=0)   # (N*H,)
    b2p = jnp.concatenate([a["b2"] for a in actor_params], axis=0)   # (N*H,)
    b3p = jnp.concatenate([a["b3"] for a in actor_params], axis=0)   # (N*A,)
    bias = jnp.zeros((3, n * hidden), jnp.float32)
    bias = (bias.at[0, :].set(b1p)
                .at[1, :].set(b2p)
                .at[2, :n * num_actions].set(b3p))

    return {
        "w1": w1p.astype(jnp.bfloat16),
        "w2": w2p.astype(jnp.bfloat16),
        "w3": w3p.astype(jnp.bfloat16),
        "bias": bias,
        "num_actors": n,
        "num_actions": num_actions,
    }


def init_actor(key, num_inputs, hidden_dim, num_actions):
    # TODO(synk): the actor class is not in the spec; a 3-layer MLP softmax policy
    # is assumed so that act(state)[1] has shape (B, num_actions).
    kw = jax.random.split(key, 6)

    def xavier(k, fi, fo):
        bound = (6.0 / (fi + fo)) ** 0.5
        return jax.random.uniform(k, (fi, fo), jnp.float32, -bound, bound)

    def small(k, n):
        return jax.random.uniform(k, (n,), jnp.float32, -0.1, 0.1)

    return {
        "w1": xavier(kw[0], num_inputs, hidden_dim), "b1": small(kw[1], hidden_dim),
        "w2": xavier(kw[2], hidden_dim, hidden_dim), "b2": small(kw[3], hidden_dim),
        "w3": xavier(kw[4], hidden_dim, num_actions), "b3": small(kw[5], num_actions),
    }


# --------------------------------------------------------------------------- references
def _ref_mean_probs_packed(state, packed):
    """Pure-JAX mirror of the kernel's exact numerics (packed bf16 weights)."""
    n, a = packed["num_actors"], packed["num_actions"]
    b1 = packed["bias"][0:1, :]
    b2 = packed["bias"][1:2, :]
    b3 = packed["bias"][2:3, :n * a]
    h = jnp.maximum(jnp.dot(state.astype(jnp.bfloat16), packed["w1"],
                            preferred_element_type=jnp.float32) + b1, 0.0)
    h = jnp.maximum(jnp.dot(h.astype(jnp.bfloat16), packed["w2"],
                            preferred_element_type=jnp.float32) + b2, 0.0)
    logits = jnp.dot(h.astype(jnp.bfloat16), packed["w3"],
                     preferred_element_type=jnp.float32) + b3
    probs = jax.nn.softmax(logits.reshape(state.shape[0], n, a), axis=-1)
    return jnp.mean(probs, axis=1)


def _ref_mean_probs_f32(state, actor_params):
    """Per-actor f32 reference matching the original torch Ensemble semantics."""
    ps = []
    for p in actor_params:
        h = jax.nn.relu(state @ p["w1"] + p["b1"])
        h = jax.nn.relu(h @ p["w2"] + p["b2"])
        ps.append(jax.nn.softmax(h @ p["w3"] + p["b3"], axis=1))
    return jnp.mean(jnp.stack(ps, axis=2), axis=2)


# --------------------------------------------------------------------------- demo / test
if __name__ == "__main__":
    B, NUM_INPUTS, HIDDEN, NUM_ACTIONS, NUM_ACTORS = 8, 16, 32, 2, 2

    key = jax.random.PRNGKey(0)
    keys = jax.random.split(key, NUM_ACTORS + 1)
    state = jax.random.normal(keys[0], (B, NUM_INPUTS), jnp.float32)
    actors = [init_actor(k, NUM_INPUTS, HIDDEN, NUM_ACTIONS) for k in keys[1:]]
    packed = pack_ensemble(actors)

    probs = ensemble_mean_probs(state, packed)     # (B, NUM_ACTIONS)
    action = ensemble_forward(state, packed)       # (B,)  == Ensemble.forward
    jax.block_until_ready((probs, action))

    ref_exact = _ref_mean_probs_packed(state, packed)   # same numerics as kernel
    ref_f32 = _ref_mean_probs_f32(state, actors)        # original f32 semantics

    assert jnp.allclose(probs, ref_exact, atol=1e-4, rtol=1e-4), \
        "mean-probs mismatch vs packed bf16 reference"
    assert jnp.allclose(probs, ref_f32, atol=3e-2), \
        "mean-probs mismatch vs per-actor f32 reference"
    assert jnp.array_equal(action, jnp.argmax(ref_exact, axis=1)), \
        "action mismatch vs reference"

    print("KERNEL_OK")
</pallas_src>

<mosaic_0001>
module attributes {stable_mosaic.version = 11 : i64} {
  func.func @_ensemble_kernel(%arg0: memref<8x16xf32, #tpu.memory_space<vmem>>, %arg1: memref<16x64xbf16, #tpu.memory_space<vmem>>, %arg2: memref<64x64xbf16, #tpu.memory_space<vmem>>, %arg3: memref<64x4xbf16, #tpu.memory_space<vmem>>, %arg4: memref<3x64xf32, #tpu.memory_space<vmem>>, %arg5: memref<8x2xf32, #tpu.memory_space<vmem>>) attributes {dimension_semantics = [], scalar_prefetch = 0 : i64, scratch_operands = 0 : i64, tpu.core_type = #tpu.core_type<tc>} {
    %c0 = arith.constant 0 : index
    %c0_0 = arith.constant 0 : index
    %0 = vector.load %arg0[%c0, %c0_0] : memref<8x16xf32, #tpu.memory_space<vmem>>, vector<8x16xf32>
    %c0_1 = arith.constant 0 : index
    %c0_2 = arith.constant 0 : index
    %1 = vector.load %arg4[%c0_1, %c0_2] : memref<3x64xf32, #tpu.memory_space<vmem>>, vector<1x64xf32>
    %c1 = arith.constant 1 : index
    %c0_3 = arith.constant 0 : index
    %2 = vector.load %arg4[%c1, %c0_3] : memref<3x64xf32, #tpu.memory_space<vmem>>, vector<1x64xf32>
    %c2 = arith.constant 2 : index
    %c0_4 = arith.constant 0 : index
    %3 = vector.load %arg4[%c2, %c0_4] : memref<3x64xf32, #tpu.memory_space<vmem>>, vector<1x4xf32>
    %4 = arith.truncf %0 : vector<8x16xf32> to vector<8x16xbf16>
    %c0_5 = arith.constant 0 : index
    %c0_6 = arith.constant 0 : index
    %5 = vector.load %arg1[%c0_5, %c0_6] : memref<16x64xbf16, #tpu.memory_space<vmem>>, vector<16x64xbf16>
    %cst = arith.constant dense<0.000000e+00> : vector<8x64xf32>
    %6 = tpu.matmul %4, %5, %cst {dimension_numbers = #tpu.dot_dimension_numbers<[1], [0], [0], [1], [0, 0, 1, 1], [], []>} : vector<8x16xbf16>, vector<16x64xbf16>, vector<8x64xf32> -> vector<8x64xf32>
    %7 = vector.broadcast %1 : vector<1x64xf32> to vector<8x64xf32>
    %8 = arith.addf %6, %7 : vector<8x64xf32>
    %cst_7 = arith.constant 0.000000e+00 : f32
    %9 = vector.broadcast %cst_7 : f32 to vector<8x64xf32>
    %10 = arith.maximumf %8, %9 : vector<8x64xf32>
    %11 = arith.truncf %10 : vector<8x64xf32> to vector<8x64xbf16>
    %c0_8 = arith.constant 0 : index
    %c0_9 = arith.constant 0 : index
    %12 = vector.load %arg2[%c0_8, %c0_9] : memref<64x64xbf16, #tpu.memory_space<vmem>>, vector<64x64xbf16>
    %cst_10 = arith.constant dense<0.000000e+00> : vector<8x64xf32>
    %13 = tpu.matmul %11, %12, %cst_10 {dimension_numbers = #tpu.dot_dimension_numbers<[1], [0], [0], [1], [0, 0, 1, 1], [], []>} : vector<8x64xbf16>, vector<64x64xbf16>, vector<8x64xf32> -> vector<8x64xf32>
    %14 = vector.broadcast %2 : vector<1x64xf32> to vector<8x64xf32>
    %15 = arith.addf %13, %14 : vector<8x64xf32>
    %cst_11 = arith.constant 0.000000e+00 : f32
    %16 = vector.broadcast %cst_11 : f32 to vector<8x64xf32>
    %17 = arith.maximumf %15, %16 : vector<8x64xf32>
    %18 = arith.truncf %17 : vector<8x64xf32> to vector<8x64xbf16>
    %c0_12 = arith.constant 0 : index
    %c0_13 = arith.constant 0 : index
    %19 = vector.load %arg3[%c0_12, %c0_13] : memref<64x4xbf16, #tpu.memory_space<vmem>>, vector<64x4xbf16>
    %cst_14 = arith.constant dense<0.000000e+00> : vector<8x4xf32>
    %20 = tpu.matmul %18, %19, %cst_14 {dimension_numbers = #tpu.dot_dimension_numbers<[1], [0], [0], [1], [0, 0, 1, 1], [], []>} : vector<8x64xbf16>, vector<64x4xbf16>, vector<8x4xf32> -> vector<8x4xf32>
    %21 = vector.broadcast %3 : vector<1x4xf32> to vector<8x4xf32>
    %22 = arith.addf %20, %21 : vector<8x4xf32>
    %cst_15 = arith.constant 0.000000e+00 : f32
    %23 = vector.broadcast %cst_15 : f32 to vector<8x2xf32>
    %24 = vector.extract_strided_slice %22 {offsets = [0, 0], sizes = [8, 2], strides = [1, 1]} : vector<8x4xf32> to vector<8x2xf32>
    %cst_16 = arith.constant dense<0xFF800000> : vector<8xf32>
    %25 = vector.multi_reduction <maximumf>, %24, %cst_16 [1] : vector<8x2xf32> to vector<8xf32>
    %26 = vector.shape_cast %25 : vector<8xf32> to vector<8x1xf32>
    %27 = vector.broadcast %26 : vector<8x1xf32> to vector<8x2xf32>
    %28 = arith.subf %24, %27 : vector<8x2xf32>
    %29 = math.exp %28 : vector<8x2xf32>
    %cst_17 = arith.constant dense<0.000000e+00> : vector<8xf32>
    %30 = vector.multi_reduction <add>, %29, %cst_17 [1] : vector<8x2xf32> to vector<8xf32>
    %31 = vector.shape_cast %30 : vector<8xf32> to vector<8x1xf32>
    %32 = vector.broadcast %31 : vector<8x1xf32> to vector<8x2xf32>
    %33 = arith.divf %29, %32 : vector<8x2xf32>
    %34 = arith.addf %23, %33 : vector<8x2xf32>
    %35 = vector.extract_strided_slice %22 {offsets = [0, 2], sizes = [8, 2], strides = [1, 1]} : vector<8x4xf32> to vector<8x2xf32>
    %cst_18 = arith.constant dense<0xFF800000> : vector<8xf32>
    %36 = vector.multi_reduction <maximumf>, %35, %cst_18 [1] : vector<8x2xf32> to vector<8xf32>
    %37 = vector.shape_cast %36 : vector<8xf32> to vector<8x1xf32>
    %38 = vector.broadcast %37 : vector<8x1xf32> to vector<8x2xf32>
    %39 = arith.subf %35, %38 : vector<8x2xf32>
    %40 = math.exp %39 : vector<8x2xf32>
    %cst_19 = arith.constant dense<0.000000e+00> : vector<8xf32>
    %41 = vector.multi_reduction <add>, %40, %cst_19 [1] : vector<8x2xf32> to vector<8xf32>
    %42 = vector.shape_cast %41 : vector<8xf32> to vector<8x1xf32>
    %43 = vector.broadcast %42 : vector<8x1xf32> to vector<8x2xf32>
    %44 = arith.divf %40, %43 : vector<8x2xf32>
    %45 = arith.addf %34, %44 : vector<8x2xf32>
    %cst_20 = arith.constant 5.000000e-01 : f32
    %46 = vector.broadcast %cst_20 : f32 to vector<8x2xf32>
    %47 = arith.mulf %45, %46 : vector<8x2xf32>
    %c0_21 = arith.constant 0 : index
    %c0_22 = arith.constant 0 : index
    %48 = vector.load %arg5[%c0_21, %c0_22] : memref<8x2xf32, #tpu.memory_space<vmem>>, vector<8x2xf32>
    tpu.vector_store %arg5[%c0_21, %c0_22], %47 {strides = array<i32>} : memref<8x2xf32, #tpu.memory_space<vmem>>, vector<8x2xf32>,
    return
  }
}

</mosaic_0001>

<bundles_post_ra>
// kernel: tpu_custom_call.1
= control target key start
LH: loop header
LB: loop body
LE: loop exit
PB: predicated region body
PF: predicated region fallthrough
CT: control target
= control target key end

     0   :  { %10 = vsyncpa [#allocation3], 0  ;;  %s404_s18 = smov [#allocation2]   ;;  %s497_s0 = inlined_call_operand.vmem [shape: f32[8,16], index: 0, kind: input, shape index: {}]   ;;  %s498_s1 = inlined_call_operand.hbm [shape: bf16[16,64], index: 1, kind: input, shape index: {}]   ;;  %s499_s2 = inlined_call_operand.vmem [shape: bf16[64,64], index: 2, kind: input, shape index: {}]   ;;  %s500_s3 = inlined_call_operand.vmem [shape: bf16[64,4], index: 3, kind: input, shape index: {}]   ;;  %s501_s4 = inlined_call_operand.vmem [shape: f32[3,64], index: 4, kind: input, shape index: {}]   ;;  %s502_s5 = inlined_call_operand.vmem [shape: f32[8,2], index: 5, kind: output, shape index: {}]  }
   0x1   :  { %s18_s19 = sshll.u32 %s404_s18, 4  ;;  %s380_s22 = scalar_lea.hbm %s498_s1, 128  ;;  %s19_s19 = int_to_ptr.vmem [resolvable:$true] %s18_s19 }
   0x2   :  { %p381_p0 = scmp.ne.s32.totalorder %s498_s1, %s380_s22  ;;  %p384_p1 = scmp.lt.u32.totalorder %s380_s22, %s498_s1 }
   0x4   :  { %p386_p2 = pnand %p384_p1, %p381_p0 }
   0x6   :  { %389 = shalt.err (!%p386_p2)
}
   0x7   :  { %s390_s27 = scalar_lea.vmem %s19_s19, 128  ;;  %p395_p4 = scmp.lt.s32.totalorder %s19_s19, %s19_s19 }
   0x8   :  { %p391_p3 = scmp.ne.s32.totalorder %s19_s19, %s390_s27  ;;  %p396_p5 = scmp.lt.s32.totalorder %s390_s27, %s390_s27 }
   0xa   :  { %p397_p6 = por %p396_p5, %p395_p4 }
   0xc   :  { %p398_p7 = pnand %p397_p6, %p391_p3 }
   0xe   :  { %401 = shalt.err (!%p398_p7)
}
   0xf   :  { %s405_s28 = smov 64   ;;  %s406_s29 = smov 4  }
  0x10   :  { %24 = dma.hbm_to_vmem [thread:$0]  %s498_s1, 128, %s19_s19, [#allocation3], %s405_s28, %s405_s28, %s406_s29  }
  0x11   :  { %402 = dma.done.wait [#allocation3], 128  }
  0x12   :  { %403 = vsyncadd [#allocation3], 4294967168  ;;  %v407_v0 = vmov 0.0   ;;  %vm408_vm0 = vmmov 0   ;;  %v363_v1 = vld [vmem:[#allocation2] sm:$0xff]   ;;  %vm52_vm1 = vcmask 130048  }
  0x13   :  { %327 = vmatprep.subr.bf16.mxu0 %v407_v0  ;;  %329 = vmatprep.mubr.msk.bf16.mxu0 %vm408_vm0, %v407_v0  ;;  %v35_v2 = vld [vmem:[%s497_s0] sm:$0xff]  ;;  %v365_v5 = vld [vmem:[%s499_s2 + $0x8] sm:$0xff]   ;;  %v366_v6 = vld [vmem:[%s499_s2 + $0x10] sm:$0xff]   ;;  %vm134_vm2 = vcmask 523264   ;;  %vm272_vm3 = vcmask 31760   ;;  %vm259_vm4 = vcmask 15360  }
  0x14   :  { %333 = vmatprep.subr.bf16.mxu1 %v407_v0  ;;  %341 = vmatprep.mubr.msk.bf16.mxu1 %vm408_vm0, %v407_v0  ;;  %v39_v3 = vpack.c.bf16 %v35_v2, %v35_v2  ;;  %v364_v4 = vld [vmem:[%s499_s2] sm:$0xff]   ;;  %v367_v7 = vld [vmem:[%s499_s2 + $0x18] sm:$0xff]   ;;  %v369_v9 = vld [vmem:[%s500_s3 + $0x8] sm:$0xff]  }
  0x15   :  { %328 = vmatpush3.bf16.msra.mxu0 %v363_v1  ;;  %334 = vmatpush3.bf16.msra.mxu1 %v364_v4  ;;  %v368_v8 = vld [vmem:[%s500_s3] sm:$0xff]   ;;  %v370_v18 = vld [vmem:[%s500_s3 + $0x10] sm:$0xff]   ;;  %v371_v19 = vld [vmem:[%s500_s3 + $0x18] sm:$0xff]   ;;  %s409_s3 = smov 126  }
  0x16   :  { %345 = vmatprep.subr.bf16.mxu0 %v407_v0  ;;  %335 = vmatprep.subr.bf16.mxu1 %v407_v0  ;;  %v300_v10 = vld [vmem:[%s501_s4] ss:$0 sm:$0xff]  ;;  %v303_v20 = vld [vmem:[%s501_s4 + $0x1] ss:$0 sm:$0xff]  ;;  %v309_v28 = vld [vmem:[%s501_s4 + $0x2] ss:$0 sm:$0xff] }
  0x18   :  { %330 = vmatmul.mubr.msk.bf16.vlgmr.msra.gmra.mrb[0].mxu0 %vm52_vm1, %v39_v3 }
  0x19   :  { %353 = vmatprep.mubr.msk.bf16.mxu0 %vm408_vm0, %v407_v0  ;;  %336 = vmatpush3.bf16.msra.mxu1 %v365_v5 }
  0x1a   :  { %337 = vmatprep.subr.bf16.mxu1 %v407_v0  ;;  %346 = vmatpush3.bf16.msra.mxu0 %v368_v8 }
  0x1b   :  { %347 = vmatprep.subr.bf16.mxu0 %v407_v0 }
  0x1d   :  { %338 = vmatpush3.bf16.msra.mxu1 %v366_v6 }
  0x1e   :  { %339 = vmatprep.subr.bf16.mxu1 %v407_v0  ;;  %348 = vmatpush3.bf16.msra.mxu0 %v369_v9 }
  0x1f   :  { %349 = vmatprep.subr.bf16.mxu0 %v407_v0 }
  0x21   :  { %340 = vmatpush3.bf16.msra.mxu1 %v367_v7 }
  0x22   :  { %350 = vmatpush3.bf16.msra.mxu0 %v370_v18 }
  0x23   :  { %351 = vmatprep.subr.bf16.mxu0 %v407_v0 }
  0x26   :  { %352 = vmatpush3.bf16.msra.mxu0 %v371_v19 }
  0xeb   :  { %v90_v11 = vpop.f32.mrb[0].mxu0 }
  0xec   :  { %v91_v12 = vadd.f32 %v300_v10, %v90_v11  ;;  %v331_v13 = vpop.f32.mrb[1].mxu0 }
  0xed   :  { %v93_v14 = vpop.f32.mrb[2].mxu0 }
  0xee   :  { %v96_v15 = vmax.f32 %v91_v12, 0.0  ;;  %v332_v16 = vpop.f32.mrb[3].mxu0 }
  0xf0   :  { %v97_v17 = vpack.c.bf16 %v96_v15, %v96_v15 }
  0xf2   :  { %342 = vmatmul.mubr.msk.bf16.vlgmr.msra.gmra.mrb[0].mxu1 %vm134_vm2, %v97_v17 }
 0x1c5   :  { %v172_v21 = vpop.f32.mrb[0].mxu1 }
 0x1c6   :  { %v173_v22 = vadd.f32 %v303_v20, %v172_v21  ;;  %v343_v23 = vpop.f32.mrb[1].mxu1 }
 0x1c7   :  { %v175_v24 = vpop.f32.mrb[2].mxu1 }
 0x1c8   :  { %v178_v25 = vmax.f32 %v173_v22, 0.0  ;;  %v344_v26 = vpop.f32.mrb[3].mxu1 }
 0x1ca   :  { %v179_v27 = vpack.c.bf16 %v178_v25, %v178_v25 }
 0x1cc   :  { %354 = vmatmul.mubr.msk.bf16.vlgmr.msra.gmra.mrb[4].mxu0 %vm134_vm2, %v179_v27 }
 0x29f   :  { %v253_v29 = vpop.f32.mrb[4].mxu0 }
 0x2a0   :  { %v254_v30 = vadd.f32 %v309_v28, %v253_v29  ;;  %v355_v31 = vpop.f32.mrb[5].mxu0 }
 0x2a1   :  { %v256_v32 = vpop.f32.mrb[6].mxu0 }
 0x2a2   :  { %v356_v33 = vpop.f32.mrb[7].mxu0  ;;  %v273_v34 = vsel %vm272_vm3, %v254_v30, -inf  ;;  %v260_v35 = vsel %vm259_vm4, %v254_v30, -inf }
 0x2a3   :  { %274 = vmax.xlane.f32.xlu0 %v273_v34  ;;  %261 = vmax.xlane.f32.xlu1 %v260_v35 }
 0x330   :  { %v275_v36 = vpop.xlane.xlu0 %274  ;;  %v262_v40 = vpop.xlane.xlu1 %261 }
 0x331   :  { %v276_v37 = vsub.f32 %v254_v30, %v275_v36  ;;  %v263_v41 = vsub.f32 %v254_v30, %v262_v40 }
 0x333   :  { %v277_v38 = vmul.f32 1.442695, %v276_v37  ;;  %v264_v42 = vmul.f32 1.442695, %v263_v41 }
 0x335   :  { %372 = vpow2.f32 %v277_v38 }
 0x336   :  { %374 = vpow2.f32 %v264_v42 }
 0x33f   :  { %v373_v39 = vpop.eup %372 }
 0x340   :  { %280 = vrot.lane.b32.xlu0 %v373_v39, %s409_s3  ;;  %v375_v45 = vpop.eup %374 }
 0x341   :  { %v266_v46 = vsel %vm259_vm4, %v375_v45, 0.0 }
 0x3b2   :  { %v281_v43 = vpop.permute.xlu0 %280 }
 0x3b3   :  { %v283_v44 = vsel %vm259_vm4, %v281_v43, 0.0 }
 0x3b4   :  { %284 = vadd.xlane.f32.xlu1 %v283_v44 }
 0x3b8   :  { %267 = vadd.xlane.f32.xlu1 %v266_v46 }
 0x441   :  { %v285_v47 = vpop.xlane.xlu1 %284 }
 0x442   :  { %376 = vrcp.f32 %v285_v47 }
 0x445   :  { %v268_v50 = vpop.xlane.xlu1 %267 }
 0x446   :  { %378 = vrcp.f32 %v268_v50 }
 0x44c   :  { %v377_v48 = vpop.eup %376 }
 0x44d   :  { %v287_v49 = vmul.f32 %v377_v48, %v373_v39 }
 0x44f   :  { %289 = vrot.lane.b32.xlu1 %v287_v49, %s409_s3 }
 0x450   :  { %v379_v51 = vpop.eup %378 }
 0x451   :  { %v270_v52 = vmul.f32 %v379_v51, %v375_v45 }
 0x4c1   :  { %v290_v53 = vpop.permute.xlu1 %289 }
 0x4c2   :  { %v292_v54 = vadd.f32 %v290_v53, %v270_v52 }
 0x4c4   :  { %v293_v55 = vmul.f32 0.5, %v292_v54 }
 0x4c6   :  { %294 = vst.msk [vmem:[%s502_s5] sm:$0xff] %vm259_vm4, %v293_v55 }
 0x4c7   :  { %299 = vsyncpa [#allocation3], 1 }

</bundles_post_ra>
